<compile_context>
chip_gen: v7x
topology: tpu7x:2x2x1
jax: 0.10.0
libtpu: 0.0.40
codegen_flags: <defaults>
</compile_context>

<pallas_src>
import jax
import jax.numpy as jnp
from jax import lax
from jax.experimental import pallas as pl
from jax.experimental.pallas import tpu as pltpu

EPS = 1e-5
LANES = 128  # padded feature width (all hidden dims <= 32)


def _round_up(n, m):
    return ((n + m - 1) // m) * m


def _build_kernel(s_pad, v0):
    """Kernel closure over the static slab layout."""
    w_offs = (0, s_pad, s_pad + 32, s_pad + 64)   # row offsets of w1..w4
    k_sizes = (s_pad, 32, 32, 32)                 # padded fan_in per layer

    def kernel(x_ref, p_ref, out_ref):
        # x_ref  : (B, s_pad)           unpadded/row-padded input
        # p_ref  : (s_pad + 112, 128)   single packed parameter slab
        #   rows [0, s_pad)             : w1  (S x 16, zero-padded)
        #   rows [s_pad, s_pad+32)      : w2  (16 x 32, zero-padded)
        #   rows [s_pad+32, s_pad+64)   : w3  (32 x 32, zero-padded)
        #   rows [s_pad+64, s_pad+96)   : w4  (32 x 16, zero-padded)
        #   rows v0+0..3  : b1..b4      rows v0+4..7  : gamma1..4
        #   rows v0+8..11 : beta1..4    row  v0+12    : w5 as a row
        #   row  v0+13 lane 0 : b5
        inv_b = 1.0 / x_ref.shape[0]  # static batch size
        h = x_ref[...]

        for i in range(4):
            w = p_ref[w_offs[i]:w_offs[i] + k_sizes[i], :]
            hk = h if i == 0 else h[:, :32]   # valid lanes of previous layer
            # Linear + ReLU (padded weight rows/cols are zero -> exact).
            z = jnp.dot(hk, w, preferred_element_type=jnp.float32)
            b = p_ref[v0 + i:v0 + i + 1, :]
            a = jnp.maximum(z + b, 0.0)

            # BatchNorm1d, training mode: one-pass biased batch stats,
            # variance clamped to >= 0, affine fused into a single mul+add.
            mu = jnp.sum(a, axis=0, keepdims=True) * inv_b
            ex2 = jnp.sum(a * a, axis=0, keepdims=True) * inv_b
            var = jnp.maximum(ex2 - mu * mu, 0.0)
            g = p_ref[v0 + 4 + i:v0 + 5 + i, :]
            be = p_ref[v0 + 8 + i:v0 + 9 + i, :]
            s = g * lax.rsqrt(var + EPS)
            t = be - mu * s
            h = a * s + t                     # padded lanes: 0*0 + 0 = 0

        # Final Linear(16, 1): VPU multiply + XLU lane reduce (no MXU pass
        # for a single output column).
        w5_row = p_ref[v0 + 12:v0 + 13, :]    # (1, 128), lanes >= 16 are zero
        b5 = p_ref[v0 + 13:v0 + 14, 0:1]      # (1, 1)
        out_ref[...] = (jnp.sum(h * w5_row, axis=-1, keepdims=True) + b5
                        ).astype(out_ref.dtype)

    return kernel


def init_valuenet_params(state_size, key):
    """Deterministic PyTorch-style init: U(-1/sqrt(fan_in), 1/sqrt(fan_in))."""
    dims = [(state_size, 16), (16, 32), (32, 32), (32, 16), (16, 1)]
    params = []
    for (fan_in, fan_out) in dims:
        key, kw, kb = jax.random.split(key, 3)
        bound = 1.0 / jnp.sqrt(jnp.float32(fan_in))
        w = jax.random.uniform(kw, (fan_in, fan_out), jnp.float32, -bound, bound)
        b = jax.random.uniform(kb, (1, fan_out), jnp.float32, -bound, bound)
        params.append((w, b))
    bn_dims = [16, 32, 32, 16]
    bn_params = [(jnp.ones((1, d), jnp.float32), jnp.zeros((1, d), jnp.float32))
                 for d in bn_dims]
    return params, bn_params


def pack_valuenet_params(params, bn_params):
    """Pack the 17 small parameter tensors into ONE lane-padded slab."""
    (w1, b1), (w2, b2), (w3, b3), (w4, b4), (w5, b5) = params
    S = w1.shape[0]
    s_pad = _round_up(S, 8)
    v0 = s_pad + 96
    n_rows = _round_up(v0 + 14, 8)

    slab = jnp.zeros((n_rows, LANES), jnp.float32)
    w_offs = (0, s_pad, s_pad + 32, s_pad + 64)
    for off, w in zip(w_offs, (w1, w2, w3, w4)):
        fi, fo = w.shape
        slab = slab.at[off:off + fi, :fo].set(w.astype(jnp.float32))
    for i, b in enumerate((b1, b2, b3, b4)):
        slab = slab.at[v0 + i, :b.shape[-1]].set(
            b.reshape(-1).astype(jnp.float32))
    for i, (g, be) in enumerate(bn_params):
        slab = slab.at[v0 + 4 + i, :g.shape[-1]].set(
            g.reshape(-1).astype(jnp.float32))
        slab = slab.at[v0 + 8 + i, :be.shape[-1]].set(
            be.reshape(-1).astype(jnp.float32))
    slab = slab.at[v0 + 12, :w5.shape[0]].set(w5[:, 0].astype(jnp.float32))
    slab = slab.at[v0 + 13, 0].set(b5.reshape(-1)[0].astype(jnp.float32))
    return slab, s_pad, v0, S


def make_value_net(params, bn_params):
    """Pack parameters ONCE and return a jitted forward(x) callable."""
    slab, s_pad, v0, state_size = pack_valuenet_params(params, bn_params)
    slab = jax.device_put(slab)
    kernel = _build_kernel(s_pad, v0)
    vmem = pl.BlockSpec(memory_space=pltpu.MemorySpace.VMEM)

    @jax.jit
    def forward(x, slab):
        B, S = x.shape
        x = x.astype(jnp.float32)
        if S != s_pad:  # static shape decision; S=multiple of 8 needs no pad
            x = jnp.pad(x, ((0, 0), (0, s_pad - S)))
        return pl.pallas_call(
            kernel,
            out_shape=jax.ShapeDtypeStruct((B, 1), jnp.float32),
            in_specs=[vmem, vmem],
            out_specs=vmem,
        )(x, slab)

    # NOTE: like PyTorch BatchNorm1d in training mode, B >= 2 is assumed.
    return lambda x: forward(x, slab)


def value_net_reference(x, params, bn_params):
    """Pure-JAX reference (PyTorch BN train-mode, two-pass variance)."""
    (w1, b1), (w2, b2), (w3, b3), (w4, b4), (w5, b5) = params

    def bn(h, g, be):
        mu = jnp.mean(h, axis=0, keepdims=True)
        var = jnp.mean((h - mu) ** 2, axis=0, keepdims=True)
        return (h - mu) / jnp.sqrt(var + EPS) * g + be

    h = x
    for (w, b), (g, be) in zip([(w1, b1), (w2, b2), (w3, b3), (w4, b4)],
                               bn_params):
        h = bn(jnp.maximum(h @ w + b, 0.0), g, be)
    return h @ w5 + b5


if __name__ == "__main__":
    batch = 8
    state_size = 8

    key = jax.random.PRNGKey(0)
    key, kx = jax.random.split(key)
    x = jax.random.normal(kx, (batch, state_size), jnp.float32)

    params, bn_params = init_valuenet_params(state_size, key)

    value_net = make_value_net(params, bn_params)   # packs slab once
    out = jax.block_until_ready(value_net(x))

    ref = value_net_reference(x, params, bn_params)
    assert out.shape == (batch, 1), out.shape
    assert jnp.allclose(out, ref, atol=1e-3, rtol=1e-3), (out, ref)

    print("KERNEL_OK")
</pallas_src>

<mosaic_0001>
module attributes {stable_mosaic.version = 11 : i64} {
  func.func @kernel(%arg0: memref<8x8xf32, #tpu.memory_space<vmem>>, %arg1: memref<120x128xf32, #tpu.memory_space<vmem>>, %arg2: memref<8x1xf32, #tpu.memory_space<vmem>>) attributes {dimension_semantics = [], scalar_prefetch = 0 : i64, scratch_operands = 0 : i64, tpu.core_type = #tpu.core_type<tc>} {
    %c0 = arith.constant 0 : index
    %c0_0 = arith.constant 0 : index
    %0 = vector.load %arg0[%c0, %c0_0] : memref<8x8xf32, #tpu.memory_space<vmem>>, vector<8x8xf32>
    %c0_1 = arith.constant 0 : index
    %c0_2 = arith.constant 0 : index
    %1 = vector.load %arg1[%c0_1, %c0_2] : memref<120x128xf32, #tpu.memory_space<vmem>>, vector<8x128xf32>
    %cst = arith.constant dense<0.000000e+00> : vector<8x128xf32>
    %2 = tpu.matmul %0, %1, %cst {dimension_numbers = #tpu.dot_dimension_numbers<[1], [0], [0], [1], [0, 0, 1, 1], [], []>} : vector<8x8xf32>, vector<8x128xf32>, vector<8x128xf32> -> vector<8x128xf32>
    %c104 = arith.constant 104 : index
    %c0_3 = arith.constant 0 : index
    %3 = vector.load %arg1[%c104, %c0_3] : memref<120x128xf32, #tpu.memory_space<vmem>>, vector<1x128xf32>
    %4 = vector.broadcast %3 : vector<1x128xf32> to vector<8x128xf32>
    %5 = arith.addf %2, %4 : vector<8x128xf32>
    %cst_4 = arith.constant 0.000000e+00 : f32
    %6 = vector.broadcast %cst_4 : f32 to vector<8x128xf32>
    %7 = arith.maximumf %5, %6 : vector<8x128xf32>
    %cst_5 = arith.constant dense<0.000000e+00> : vector<128xf32>
    %8 = vector.multi_reduction <add>, %7, %cst_5 [0] : vector<8x128xf32> to vector<128xf32>
    %9 = vector.shape_cast %8 : vector<128xf32> to vector<1x128xf32>
    %cst_6 = arith.constant 1.250000e-01 : f32
    %10 = vector.broadcast %cst_6 : f32 to vector<1x128xf32>
    %11 = arith.mulf %9, %10 : vector<1x128xf32>
    %12 = arith.mulf %7, %7 : vector<8x128xf32>
    %cst_7 = arith.constant dense<0.000000e+00> : vector<128xf32>
    %13 = vector.multi_reduction <add>, %12, %cst_7 [0] : vector<8x128xf32> to vector<128xf32>
    %14 = vector.shape_cast %13 : vector<128xf32> to vector<1x128xf32>
    %cst_8 = arith.constant 1.250000e-01 : f32
    %15 = vector.broadcast %cst_8 : f32 to vector<1x128xf32>
    %16 = arith.mulf %14, %15 : vector<1x128xf32>
    %17 = arith.mulf %11, %11 : vector<1x128xf32>
    %18 = arith.subf %16, %17 : vector<1x128xf32>
    %cst_9 = arith.constant 0.000000e+00 : f32
    %19 = vector.broadcast %cst_9 : f32 to vector<1x128xf32>
    %20 = arith.maximumf %18, %19 : vector<1x128xf32>
    %c108 = arith.constant 108 : index
    %c0_10 = arith.constant 0 : index
    %21 = vector.load %arg1[%c108, %c0_10] : memref<120x128xf32, #tpu.memory_space<vmem>>, vector<1x128xf32>
    %c112 = arith.constant 112 : index
    %c0_11 = arith.constant 0 : index
    %22 = vector.load %arg1[%c112, %c0_11] : memref<120x128xf32, #tpu.memory_space<vmem>>, vector<1x128xf32>
    %cst_12 = arith.constant 9.99999974E-6 : f32
    %23 = vector.broadcast %cst_12 : f32 to vector<1x128xf32>
    %24 = arith.addf %20, %23 : vector<1x128xf32>
    %25 = math.rsqrt %24 : vector<1x128xf32>
    %26 = arith.mulf %21, %25 : vector<1x128xf32>
    %27 = arith.mulf %11, %26 : vector<1x128xf32>
    %28 = arith.subf %22, %27 : vector<1x128xf32>
    %29 = vector.broadcast %26 : vector<1x128xf32> to vector<8x128xf32>
    %30 = arith.mulf %7, %29 : vector<8x128xf32>
    %31 = vector.broadcast %28 : vector<1x128xf32> to vector<8x128xf32>
    %32 = arith.addf %30, %31 : vector<8x128xf32>
    %c8 = arith.constant 8 : index
    %c0_13 = arith.constant 0 : index
    %33 = vector.load %arg1[%c8, %c0_13] : memref<120x128xf32, #tpu.memory_space<vmem>>, vector<32x128xf32>
    %34 = vector.extract_strided_slice %32 {offsets = [0, 0], sizes = [8, 32], strides = [1, 1]} : vector<8x128xf32> to vector<8x32xf32>
    %cst_14 = arith.constant dense<0.000000e+00> : vector<8x128xf32>
    %35 = tpu.matmul %34, %33, %cst_14 {dimension_numbers = #tpu.dot_dimension_numbers<[1], [0], [0], [1], [0, 0, 1, 1], [], []>} : vector<8x32xf32>, vector<32x128xf32>, vector<8x128xf32> -> vector<8x128xf32>
    %c105 = arith.constant 105 : index
    %c0_15 = arith.constant 0 : index
    %36 = vector.load %arg1[%c105, %c0_15] : memref<120x128xf32, #tpu.memory_space<vmem>>, vector<1x128xf32>
    %37 = vector.broadcast %36 : vector<1x128xf32> to vector<8x128xf32>
    %38 = arith.addf %35, %37 : vector<8x128xf32>
    %cst_16 = arith.constant 0.000000e+00 : f32
    %39 = vector.broadcast %cst_16 : f32 to vector<8x128xf32>
    %40 = arith.maximumf %38, %39 : vector<8x128xf32>
    %cst_17 = arith.constant dense<0.000000e+00> : vector<128xf32>
    %41 = vector.multi_reduction <add>, %40, %cst_17 [0] : vector<8x128xf32> to vector<128xf32>
    %42 = vector.shape_cast %41 : vector<128xf32> to vector<1x128xf32>
    %cst_18 = arith.constant 1.250000e-01 : f32
    %43 = vector.broadcast %cst_18 : f32 to vector<1x128xf32>
    %44 = arith.mulf %42, %43 : vector<1x128xf32>
    %45 = arith.mulf %40, %40 : vector<8x128xf32>
    %cst_19 = arith.constant dense<0.000000e+00> : vector<128xf32>
    %46 = vector.multi_reduction <add>, %45, %cst_19 [0] : vector<8x128xf32> to vector<128xf32>
    %47 = vector.shape_cast %46 : vector<128xf32> to vector<1x128xf32>
    %cst_20 = arith.constant 1.250000e-01 : f32
    %48 = vector.broadcast %cst_20 : f32 to vector<1x128xf32>
    %49 = arith.mulf %47, %48 : vector<1x128xf32>
    %50 = arith.mulf %44, %44 : vector<1x128xf32>
    %51 = arith.subf %49, %50 : vector<1x128xf32>
    %cst_21 = arith.constant 0.000000e+00 : f32
    %52 = vector.broadcast %cst_21 : f32 to vector<1x128xf32>
    %53 = arith.maximumf %51, %52 : vector<1x128xf32>
    %c109 = arith.constant 109 : index
    %c0_22 = arith.constant 0 : index
    %54 = vector.load %arg1[%c109, %c0_22] : memref<120x128xf32, #tpu.memory_space<vmem>>, vector<1x128xf32>
    %c113 = arith.constant 113 : index
    %c0_23 = arith.constant 0 : index
    %55 = vector.load %arg1[%c113, %c0_23] : memref<120x128xf32, #tpu.memory_space<vmem>>, vector<1x128xf32>
    %cst_24 = arith.constant 9.99999974E-6 : f32
    %56 = vector.broadcast %cst_24 : f32 to vector<1x128xf32>
    %57 = arith.addf %53, %56 : vector<1x128xf32>
    %58 = math.rsqrt %57 : vector<1x128xf32>
    %59 = arith.mulf %54, %58 : vector<1x128xf32>
    %60 = arith.mulf %44, %59 : vector<1x128xf32>
    %61 = arith.subf %55, %60 : vector<1x128xf32>
    %62 = vector.broadcast %59 : vector<1x128xf32> to vector<8x128xf32>
    %63 = arith.mulf %40, %62 : vector<8x128xf32>
    %64 = vector.broadcast %61 : vector<1x128xf32> to vector<8x128xf32>
    %65 = arith.addf %63, %64 : vector<8x128xf32>
    %c40 = arith.constant 40 : index
    %c0_25 = arith.constant 0 : index
    %66 = vector.load %arg1[%c40, %c0_25] : memref<120x128xf32, #tpu.memory_space<vmem>>, vector<32x128xf32>
    %67 = vector.extract_strided_slice %65 {offsets = [0, 0], sizes = [8, 32], strides = [1, 1]} : vector<8x128xf32> to vector<8x32xf32>
    %cst_26 = arith.constant dense<0.000000e+00> : vector<8x128xf32>
    %68 = tpu.matmul %67, %66, %cst_26 {dimension_numbers = #tpu.dot_dimension_numbers<[1], [0], [0], [1], [0, 0, 1, 1], [], []>} : vector<8x32xf32>, vector<32x128xf32>, vector<8x128xf32> -> vector<8x128xf32>
    %c106 = arith.constant 106 : index
    %c0_27 = arith.constant 0 : index
    %69 = vector.load %arg1[%c106, %c0_27] : memref<120x128xf32, #tpu.memory_space<vmem>>, vector<1x128xf32>
    %70 = vector.broadcast %69 : vector<1x128xf32> to vector<8x128xf32>
    %71 = arith.addf %68, %70 : vector<8x128xf32>
    %cst_28 = arith.constant 0.000000e+00 : f32
    %72 = vector.broadcast %cst_28 : f32 to vector<8x128xf32>
    %73 = arith.maximumf %71, %72 : vector<8x128xf32>
    %cst_29 = arith.constant dense<0.000000e+00> : vector<128xf32>
    %74 = vector.multi_reduction <add>, %73, %cst_29 [0] : vector<8x128xf32> to vector<128xf32>
    %75 = vector.shape_cast %74 : vector<128xf32> to vector<1x128xf32>
    %cst_30 = arith.constant 1.250000e-01 : f32
    %76 = vector.broadcast %cst_30 : f32 to vector<1x128xf32>
    %77 = arith.mulf %75, %76 : vector<1x128xf32>
    %78 = arith.mulf %73, %73 : vector<8x128xf32>
    %cst_31 = arith.constant dense<0.000000e+00> : vector<128xf32>
    %79 = vector.multi_reduction <add>, %78, %cst_31 [0] : vector<8x128xf32> to vector<128xf32>
    %80 = vector.shape_cast %79 : vector<128xf32> to vector<1x128xf32>
    %cst_32 = arith.constant 1.250000e-01 : f32
    %81 = vector.broadcast %cst_32 : f32 to vector<1x128xf32>
    %82 = arith.mulf %80, %81 : vector<1x128xf32>
    %83 = arith.mulf %77, %77 : vector<1x128xf32>
    %84 = arith.subf %82, %83 : vector<1x128xf32>
    %cst_33 = arith.constant 0.000000e+00 : f32
    %85 = vector.broadcast %cst_33 : f32 to vector<1x128xf32>
    %86 = arith.maximumf %84, %85 : vector<1x128xf32>
    %c110 = arith.constant 110 : index
    %c0_34 = arith.constant 0 : index
    %87 = vector.load %arg1[%c110, %c0_34] : memref<120x128xf32, #tpu.memory_space<vmem>>, vector<1x128xf32>
    %c114 = arith.constant 114 : index
    %c0_35 = arith.constant 0 : index
    %88 = vector.load %arg1[%c114, %c0_35] : memref<120x128xf32, #tpu.memory_space<vmem>>, vector<1x128xf32>
    %cst_36 = arith.constant 9.99999974E-6 : f32
    %89 = vector.broadcast %cst_36 : f32 to vector<1x128xf32>
    %90 = arith.addf %86, %89 : vector<1x128xf32>
    %91 = math.rsqrt %90 : vector<1x128xf32>
    %92 = arith.mulf %87, %91 : vector<1x128xf32>
    %93 = arith.mulf %77, %92 : vector<1x128xf32>
    %94 = arith.subf %88, %93 : vector<1x128xf32>
    %95 = vector.broadcast %92 : vector<1x128xf32> to vector<8x128xf32>
    %96 = arith.mulf %73, %95 : vector<8x128xf32>
    %97 = vector.broadcast %94 : vector<1x128xf32> to vector<8x128xf32>
    %98 = arith.addf %96, %97 : vector<8x128xf32>
    %c72 = arith.constant 72 : index
    %c0_37 = arith.constant 0 : index
    %99 = vector.load %arg1[%c72, %c0_37] : memref<120x128xf32, #tpu.memory_space<vmem>>, vector<32x128xf32>
    %100 = vector.extract_strided_slice %98 {offsets = [0, 0], sizes = [8, 32], strides = [1, 1]} : vector<8x128xf32> to vector<8x32xf32>
    %cst_38 = arith.constant dense<0.000000e+00> : vector<8x128xf32>
    %101 = tpu.matmul %100, %99, %cst_38 {dimension_numbers = #tpu.dot_dimension_numbers<[1], [0], [0], [1], [0, 0, 1, 1], [], []>} : vector<8x32xf32>, vector<32x128xf32>, vector<8x128xf32> -> vector<8x128xf32>
    %c107 = arith.constant 107 : index
    %c0_39 = arith.constant 0 : index
    %102 = vector.load %arg1[%c107, %c0_39] : memref<120x128xf32, #tpu.memory_space<vmem>>, vector<1x128xf32>
    %103 = vector.broadcast %102 : vector<1x128xf32> to vector<8x128xf32>
    %104 = arith.addf %101, %103 : vector<8x128xf32>
    %cst_40 = arith.constant 0.000000e+00 : f32
    %105 = vector.broadcast %cst_40 : f32 to vector<8x128xf32>
    %106 = arith.maximumf %104, %105 : vector<8x128xf32>
    %cst_41 = arith.constant dense<0.000000e+00> : vector<128xf32>
    %107 = vector.multi_reduction <add>, %106, %cst_41 [0] : vector<8x128xf32> to vector<128xf32>
    %108 = vector.shape_cast %107 : vector<128xf32> to vector<1x128xf32>
    %cst_42 = arith.constant 1.250000e-01 : f32
    %109 = vector.broadcast %cst_42 : f32 to vector<1x128xf32>
    %110 = arith.mulf %108, %109 : vector<1x128xf32>
    %111 = arith.mulf %106, %106 : vector<8x128xf32>
    %cst_43 = arith.constant dense<0.000000e+00> : vector<128xf32>
    %112 = vector.multi_reduction <add>, %111, %cst_43 [0] : vector<8x128xf32> to vector<128xf32>
    %113 = vector.shape_cast %112 : vector<128xf32> to vector<1x128xf32>
    %cst_44 = arith.constant 1.250000e-01 : f32
    %114 = vector.broadcast %cst_44 : f32 to vector<1x128xf32>
    %115 = arith.mulf %113, %114 : vector<1x128xf32>
    %116 = arith.mulf %110, %110 : vector<1x128xf32>
    %117 = arith.subf %115, %116 : vector<1x128xf32>
    %cst_45 = arith.constant 0.000000e+00 : f32
    %118 = vector.broadcast %cst_45 : f32 to vector<1x128xf32>
    %119 = arith.maximumf %117, %118 : vector<1x128xf32>
    %c111 = arith.constant 111 : index
    %c0_46 = arith.constant 0 : index
    %120 = vector.load %arg1[%c111, %c0_46] : memref<120x128xf32, #tpu.memory_space<vmem>>, vector<1x128xf32>
    %c115 = arith.constant 115 : index
    %c0_47 = arith.constant 0 : index
    %121 = vector.load %arg1[%c115, %c0_47] : memref<120x128xf32, #tpu.memory_space<vmem>>, vector<1x128xf32>
    %cst_48 = arith.constant 9.99999974E-6 : f32
    %122 = vector.broadcast %cst_48 : f32 to vector<1x128xf32>
    %123 = arith.addf %119, %122 : vector<1x128xf32>
    %124 = math.rsqrt %123 : vector<1x128xf32>
    %125 = arith.mulf %120, %124 : vector<1x128xf32>
    %126 = arith.mulf %110, %125 : vector<1x128xf32>
    %127 = arith.subf %121, %126 : vector<1x128xf32>
    %128 = vector.broadcast %125 : vector<1x128xf32> to vector<8x128xf32>
    %129 = arith.mulf %106, %128 : vector<8x128xf32>
    %130 = vector.broadcast %127 : vector<1x128xf32> to vector<8x128xf32>
    %131 = arith.addf %129, %130 : vector<8x128xf32>
    %c116 = arith.constant 116 : index
    %c0_49 = arith.constant 0 : index
    %132 = vector.load %arg1[%c116, %c0_49] : memref<120x128xf32, #tpu.memory_space<vmem>>, vector<1x128xf32>
    %c117 = arith.constant 117 : index
    %c0_50 = arith.constant 0 : index
    %133 = vector.load %arg1[%c117, %c0_50] : memref<120x128xf32, #tpu.memory_space<vmem>>, vector<1x1xf32>
    %134 = vector.broadcast %132 : vector<1x128xf32> to vector<8x128xf32>
    %135 = arith.mulf %131, %134 : vector<8x128xf32>
    %cst_51 = arith.constant dense<0.000000e+00> : vector<8xf32>
    %136 = vector.multi_reduction <add>, %135, %cst_51 [1] : vector<8x128xf32> to vector<8xf32>
    %137 = vector.shape_cast %136 : vector<8xf32> to vector<8x1xf32>
    %138 = vector.broadcast %133 : vector<1x1xf32> to vector<8x1xf32>
    %139 = arith.addf %137, %138 : vector<8x1xf32>
    %c0_52 = arith.constant 0 : index
    %c0_53 = arith.constant 0 : index
    %140 = vector.load %arg2[%c0_52, %c0_53] : memref<8x1xf32, #tpu.memory_space<vmem>>, vector<8x1xf32>
    tpu.vector_store %arg2[%c0_52, %c0_53], %139 {strides = array<i32>} : memref<8x1xf32, #tpu.memory_space<vmem>>, vector<8x1xf32>,
    return
  }
}

</mosaic_0001>

<bundles_post_ra>
// kernel: forward.1
= control target key start
LH: loop header
LB: loop body
LE: loop exit
PB: predicated region body
PF: predicated region fallthrough
CT: control target
= control target key end

     0   :  { %7 = vsyncpa [#allocation3], 0  ;;  %s761_s0 = inlined_call_operand.hbm [shape: f32[8,8], index: 0, kind: input, shape index: {}]   ;;  %s762_s1 = inlined_call_operand.hbm [shape: f32[120,128], index: 1, kind: input, shape index: {}]   ;;  %s763_s2 = inlined_call_operand.vmem [shape: f32[8,1], index: 2, kind: output, shape index: {}]  }
   0x1   :  { %8 = vsyncpa [#allocation5], 0  ;;  %s677_s9 = smov [#allocation2]   ;;  %s678_s11 = smov [#allocation4]  }
   0x2   :  { %s15_s10 = sshll.u32 %s677_s9, 4  ;;  %s24_s12 = sshll.u32 %s678_s11, 4  ;;  %s16_s10 = int_to_ptr.vmem [resolvable:$true] %s15_s10  ;;  %s699_s12 = int_to_ptr.vmem [resolvable:$true] %s24_s12 }
   0x3   :  { %s629_s15 = scalar_lea.hbm %s761_s0, 128 }
   0x4   :  { %p630_p0 = scmp.ne.s32.totalorder %s761_s0, %s629_s15  ;;  %p633_p1 = scmp.lt.u32.totalorder %s629_s15, %s761_s0 }
   0x6   :  { %p635_p2 = pnand %p633_p1, %p630_p0 }
   0x8   :  { %638 = shalt.err (!%p635_p2)
}
   0x9   :  { %s639_s20 = scalar_lea.vmem %s16_s10, 128  ;;  %p644_p4 = scmp.lt.s32.totalorder %s16_s10, %s16_s10 }
   0xa   :  { %p640_p3 = scmp.ne.s32.totalorder %s16_s10, %s639_s20  ;;  %p645_p5 = scmp.lt.s32.totalorder %s639_s20, %s639_s20 }
   0xc   :  { %p646_p6 = por %p645_p5, %p644_p4 }
   0xe   :  { %p647_p7 = pnand %p646_p6, %p640_p3 }
  0x10   :  { %650 = shalt.err (!%p647_p7)
}
  0x11   :  { %18 = dma.hbm_to_vmem [thread:$0]  %s761_s0, 128, %s16_s10, [#allocation3]  }
  0x12   :  { %s651_s25 = scalar_lea.hbm %s762_s1, 1920 }
  0x13   :  { %p652_p8 = scmp.ne.s32.totalorder %s762_s1, %s651_s25  ;;  %p655_p9 = scmp.lt.u32.totalorder %s651_s25, %s762_s1 }
  0x15   :  { %p657_p10 = pnand %p655_p9, %p652_p8 }
  0x17   :  { %660 = shalt.err (!%p657_p10)
}
  0x18   :  { %s661_s30 = scalar_lea.vmem %s699_s12, 1920  ;;  %p666_p12 = scmp.lt.s32.totalorder %s699_s12, %s699_s12 }
  0x19   :  { %p662_p11 = scmp.ne.s32.totalorder %s699_s12, %s661_s30  ;;  %p667_p13 = scmp.lt.s32.totalorder %s661_s30, %s661_s30 }
  0x1b   :  { %p668_p0 = por %p667_p13, %p666_p12 }
  0x1d   :  { %p669_p1 = pnand %p668_p0, %p662_p11 }
  0x1f   :  { %672 = shalt.err (!%p669_p1)
}
  0x20   :  { %s679_s0 = smov 128   ;;  %s680_s3 = smov 8  }
  0x21   :  { %30 = dma.hbm_to_vmem [thread:$0]  %s762_s1, 1920, %s699_s12, [#allocation5], %s679_s0, %s679_s0, %s680_s3  }
  0x22   :  { %673 = dma.done.wait [#allocation3], 128  }
  0x23   :  { %674 = vsyncadd [#allocation3], 4294967168 }
  0x24   :  { %675 = dma.done.wait [#allocation5], 1920  }
  0x25   :  { %676 = vsyncadd [#allocation5], 4294965376  ;;  %v681_v0 = vmov 0.0   ;;  %vm682_vm0 = vmmov 0   ;;  %vm44_vm1 = vcmask 64512   ;;  %v38_v1 = vld [vmem:[#allocation4] sm:$0xff]  ;;  %v144_v34 = vlaneseq }
  0x26   :  { %558 = vmatprep.subr.mxu0 %v681_v0  ;;  %560 = vmatprep.mubr.msk.f32.mxu0 %vm682_vm0, %v681_v0  ;;  %v37_v2 = vld [vmem:[#allocation2] sm:$0xff]  ;;  %v154_v3 = vld [vmem:[#allocation4 + $0x8] sm:$0xff]  ;;  %v155_v4 = vld [vmem:[#allocation4 + $0x10] sm:$0xff]  ;;  %v683_v6 = vmov 0.0|0.0   ;;  %vm163_vm2 = vcmask 261120   ;;  %vm523_vm3 = vcmask 7168  }
  0x27   :  { %571 = vmatprep.mubr.msk.f32.mxu1 %vm682_vm0, %v681_v0  ;;  %559 = vmatpush3.msra.mxu0 %v38_v1  ;;  %v597_v5 = vpack.c.bf16 %v155_v4, %v154_v3  ;;  %v156_v7 = vld [vmem:[#allocation4 + $0x18] sm:$0xff]  ;;  %v157_v8 = vld [vmem:[#allocation4 + $0x20] sm:$0xff]  ;;  %v531_v10 = vld [vmem:[#allocation4 + $0x68] ss:$0 sm:$0xff]  ;;  %v145_v35 = vshrl.u32 %v144_v34, 7 }
  0x28   :  { %561 = vmatmul.mubr.msk.f32.vlgmr.msra.gmra.mrb[0].mxu0 %vm44_vm1, %v37_v2  ;;  %596 = vmatprep.subr.bf16.mxu1 %v683_v6  ;;  %v600_v9 = vpack.c.bf16 %v157_v8, %v156_v7  ;;  %v137_v36 = vld [vmem:[#allocation4 + $0x6c] sm:$0x1]  ;;  %v138_v40 = vld [vmem:[#allocation4 + $0x70] sm:$0x1]  ;;  %v275_v50 = vld [vmem:[#allocation4 + $0x38] sm:$0xff] }
  0x29   :  { %582 = vmatprep.mubr.msk.f32.mxu0 %vm682_vm0, %v681_v0  ;;  %602 = vmatprep.subr.bf16.mxu0 %v683_v6  ;;  %v741_v37 = vsub.s32 0, %v145_v35  ;;  %v273_v47 = vld [vmem:[#allocation4 + $0x28] sm:$0xff]  ;;  %v274_v48 = vld [vmem:[#allocation4 + $0x30] sm:$0xff]  ;;  %v276_v51 = vld [vmem:[#allocation4 + $0x40] sm:$0xff] }
  0x2a   :  { %598 = vmatpush3.bf16.msra.mxu1 %v597_v5  ;;  %v603_v49 = vpack.c.bf16 %v274_v48, %v273_v47  ;;  %v606_v52 = vpack.c.bf16 %v276_v51, %v275_v50  ;;  %v533_v53 = vld [vmem:[#allocation4 + $0x69] ss:$0 sm:$0xff] }
  0x2b   :  { %599 = vmatprep.subr.bf16.mxu1 %v683_v6 }
  0x2c   :  { %604 = vmatpush3.bf16.msra.mxu0 %v603_v49 }
  0x2d   :  { %605 = vmatprep.subr.bf16.mxu0 %v683_v6 }
  0x2e   :  { %601 = vmatpush3.bf16.msra.mxu1 %v600_v9 }
  0x2f   :  { %608 = vmatprep.subr.bf16.mxu1 %v683_v6 }
  0x30   :  { %607 = vmatpush3.bf16.msra.mxu0 %v606_v52 }
  0xfb   :  { %v114_v11 = vpop.f32.mrb[0].mxu0 }
  0xfc   :  { %v115_v12 = vadd.f32 %v531_v10, %v114_v11  ;;  %v562_v13 = vpop.f32.mrb[1].mxu0 }
  0xfe   :  { %v118_v14 = vmax.f32 %v115_v12, 0.0 }
 0x100   :  { %v119_v15 = vrot.slane %v118_v14, 4  ;;  %v126_v16 = vmul.f32 %v118_v14, %v118_v14 }
 0x102   :  { %v120_v17 = vadd.f32 %v119_v15, %v118_v14  ;;  %v127_v18 = vrot.slane %v126_v16, 4 }
 0x104   :  { %v121_v19 = vrot.slane %v120_v17, 2  ;;  %v128_v20 = vadd.f32 %v127_v18, %v126_v16 }
 0x106   :  { %v122_v21 = vadd.f32 %v121_v19, %v120_v17  ;;  %v129_v22 = vrot.slane %v128_v20, 2  ;;  %v257_v17 = vld [vmem:[#allocation4 + $0x71] sm:$0x1] }
 0x108   :  { %v123_v23 = vrot.slane %v122_v21, 1  ;;  %v130_v24 = vadd.f32 %v129_v22, %v128_v20 }
 0x10a   :  { %v124_v25 = vadd.f32 %v123_v23, %v122_v21  ;;  %v131_v26 = vrot.slane %v130_v24, 1 }
 0x10c   :  { %v125_v27 = vmul.f32 0.125, %v124_v25  ;;  %v132_v28 = vadd.f32 %v131_v26, %v130_v24  ;;  %v391_v24 = vld [vmem:[#allocation4 + $0x48] sm:$0xff]  ;;  %v392_v25 = vld [vmem:[#allocation4 + $0x50] sm:$0xff] }
 0x10d   :  { %v609_v26 = vpack.c.bf16 %v392_v25, %v391_v24  ;;  %v492_v25 = vld [vmem:[#allocation4 + $0x6f] sm:$0x1] }
 0x10e   :  { %v133_v29 = vmul.f32 0.125, %v132_v28  ;;  %v134_v30 = vmul.f32 %v125_v27, %v125_v27  ;;  %v394_v28 = vld [vmem:[#allocation4 + $0x60] sm:$0xff] }
 0x110   :  { %v135_v31 = vsub.f32 %v133_v29, %v134_v30  ;;  %v535_v30 = vld [vmem:[#allocation4 + $0x6a] ss:$0 sm:$0xff] }
 0x112   :  { %v136_v32 = vmax.f32 %v135_v31, 0.0 }
 0x114   :  { %v139_v33 = vadd.f32 1e-05, %v136_v32 }
 0x116   :  { %621 = vrsqrt.f32 %v139_v33 }
 0x120   :  { %v622_v38 = vpop.eup %621 }
 0x121   :  { %v141_v39 = vmul.f32 %v622_v38, %v137_v36 }
 0x123   :  { %v147_v41 = vrot.slane %v141_v39, %v741_v37  ;;  %v142_v42 = vmul.f32 %v141_v39, %v125_v27  ;;  %v393_v27 = vld [vmem:[#allocation4 + $0x58] sm:$0xff] }
 0x124   :  { %v612_v29 = vpack.c.bf16 %v394_v28, %v393_v27  ;;  %v493_v28 = vld [vmem:[#allocation4 + $0x73] sm:$0x1] }
 0x125   :  { %v143_v43 = vsub.f32 %v138_v40, %v142_v42  ;;  %v148_v44 = vmul.f32 %v147_v41, %v118_v14  ;;  %v256_v14 = vld [vmem:[#allocation4 + $0x6d] sm:$0x1] }
 0x127   :  { %v152_v45 = vrot.slane %v143_v43, %v741_v37 }
 0x129   :  { %v153_v46 = vadd.f32 %v152_v45, %v148_v44 }
 0x12b   :  { %572 = vmatmul.mubr.msk.f32.vlgmr.msra.gmra.mrb[0].mxu1 %vm163_vm2, %v153_v46 }
 0x12c   :  { %593 = vmatprep.mubr.msk.f32.mxu1 %vm682_vm0, %v681_v0  ;;  %610 = vmatpush3.bf16.msra.mxu1 %v609_v26 }
 0x12d   :  { %611 = vmatprep.subr.bf16.mxu1 %v683_v6 }
 0x130   :  { %613 = vmatpush3.bf16.msra.mxu1 %v612_v29 }
 0x1fe   :  { %v233_v54 = vpop.f32.mrb[0].mxu1 }
 0x1ff   :  { %v234_v55 = vadd.f32 %v533_v53, %v233_v54  ;;  %v573_v56 = vpop.f32.mrb[1].mxu1  ;;  %v374_v54 = vld [vmem:[#allocation4 + $0x6e] sm:$0x1] }
 0x201   :  { %v237_v57 = vmax.f32 %v234_v55, 0.0 }
 0x203   :  { %v238_v58 = vrot.slane %v237_v57, 4  ;;  %v245_v59 = vmul.f32 %v237_v57, %v237_v57 }
 0x205   :  { %v239_v60 = vadd.f32 %v238_v58, %v237_v57  ;;  %v246_v61 = vrot.slane %v245_v59, 4 }
 0x207   :  { %v240_v62 = vrot.slane %v239_v60, 2  ;;  %v247_v63 = vadd.f32 %v246_v61, %v245_v59 }
 0x209   :  { %v241_v0 = vadd.f32 %v240_v62, %v239_v60  ;;  %v248_v1 = vrot.slane %v247_v63, 2 }
 0x20b   :  { %v242_v2 = vrot.slane %v241_v0, 1  ;;  %v249_v3 = vadd.f32 %v248_v1, %v247_v63 }
 0x20d   :  { %v243_v4 = vadd.f32 %v242_v2, %v241_v0  ;;  %v250_v5 = vrot.slane %v249_v3, 1  ;;  %v537_v0 = vld [vmem:[#allocation4 + $0x6b] ss:$0 sm:$0xff] }
 0x20f   :  { %v244_v7 = vmul.f32 0.125, %v243_v4  ;;  %v251_v8 = vadd.f32 %v250_v5, %v249_v3 }
 0x211   :  { %v252_v9 = vmul.f32 0.125, %v251_v8  ;;  %v253_v10 = vmul.f32 %v244_v7, %v244_v7 }
 0x213   :  { %v254_v11 = vsub.f32 %v252_v9, %v253_v10 }
 0x215   :  { %v255_v12 = vmax.f32 %v254_v11, 0.0 }
 0x217   :  { %v258_v13 = vadd.f32 1e-05, %v255_v12 }
 0x219   :  { %623 = vrsqrt.f32 %v258_v13 }
 0x223   :  { %v624_v15 = vpop.eup %623 }
 0x224   :  { %v260_v16 = vmul.f32 %v624_v15, %v256_v14 }
 0x226   :  { %v261_v18 = vmul.f32 %v260_v16, %v244_v7  ;;  %v266_v19 = vrot.slane %v260_v16, %v741_v37 }
 0x228   :  { %v262_v20 = vsub.f32 %v257_v17, %v261_v18  ;;  %v267_v21 = vmul.f32 %v266_v19, %v237_v57  ;;  %v375_v57 = vld [vmem:[#allocation4 + $0x72] sm:$0x1] }
 0x22a   :  { %v271_v22 = vrot.slane %v262_v20, %v741_v37 }
 0x22c   :  { %v272_v23 = vadd.f32 %v271_v22, %v267_v21 }
 0x22e   :  { %583 = vmatmul.mubr.msk.f32.vlgmr.msra.gmra.mrb[2].mxu0 %vm163_vm2, %v272_v23 }
 0x301   :  { %v351_v31 = vpop.f32.mrb[2].mxu0 }
 0x302   :  { %v352_v32 = vadd.f32 %v535_v30, %v351_v31  ;;  %v584_v33 = vpop.f32.mrb[3].mxu0 }
 0x304   :  { %v355_v34 = vmax.f32 %v352_v32, 0.0 }
 0x306   :  { %v356_v35 = vrot.slane %v355_v34, 4  ;;  %v363_v36 = vmul.f32 %v355_v34, %v355_v34 }
 0x308   :  { %v357_v38 = vadd.f32 %v356_v35, %v355_v34  ;;  %v364_v39 = vrot.slane %v363_v36, 4 }
 0x30a   :  { %v358_v40 = vrot.slane %v357_v38, 2  ;;  %v365_v41 = vadd.f32 %v364_v39, %v363_v36 }
 0x30c   :  { %v359_v42 = vadd.f32 %v358_v40, %v357_v38  ;;  %v366_v43 = vrot.slane %v365_v41, 2  ;;  %v540_v38 = vld [vmem:[#allocation4 + $0x75] ss:$0 sm:$0xff] }
 0x30e   :  { %v360_v44 = vrot.slane %v359_v42, 1  ;;  %v367_v45 = vadd.f32 %v366_v43, %v365_v41 }
 0x310   :  { %v361_v6 = vadd.f32 %v360_v44, %v359_v42  ;;  %v368_v46 = vrot.slane %v367_v45, 1 }
 0x312   :  { %v362_v47 = vmul.f32 0.125, %v361_v6  ;;  %v369_v48 = vadd.f32 %v368_v46, %v367_v45 }
 0x314   :  { %v370_v49 = vmul.f32 0.125, %v369_v48  ;;  %v371_v50 = vmul.f32 %v362_v47, %v362_v47 }
 0x316   :  { %v372_v51 = vsub.f32 %v370_v49, %v371_v50 }
 0x318   :  { %v373_v52 = vmax.f32 %v372_v51, 0.0 }
 0x31a   :  { %v376_v53 = vadd.f32 1e-05, %v373_v52 }
 0x31c   :  { %625 = vrsqrt.f32 %v376_v53 }
 0x326   :  { %v626_v55 = vpop.eup %625 }
 0x327   :  { %v378_v56 = vmul.f32 %v626_v55, %v374_v54 }
 0x329   :  { %v379_v58 = vmul.f32 %v378_v56, %v362_v47  ;;  %v384_v59 = vrot.slane %v378_v56, %v741_v37 }
 0x32b   :  { %v380_v60 = vsub.f32 %v375_v57, %v379_v58  ;;  %v385_v61 = vmul.f32 %v384_v59, %v355_v34  ;;  %v539_v34 = vld [vmem:[#allocation4 + $0x74] ss:$0 sm:$0xff] }
 0x32d   :  { %v389_v62 = vrot.slane %v380_v60, %v741_v37 }
 0x32f   :  { %v390_v63 = vadd.f32 %v389_v62, %v385_v61 }
 0x331   :  { %594 = vmatmul.mubr.msk.f32.vlgmr.msra.gmra.mrb[2].mxu1 %vm163_vm2, %v390_v63 }
 0x404   :  { %v469_v1 = vpop.f32.mrb[2].mxu1 }
 0x405   :  { %v470_v2 = vadd.f32 %v537_v0, %v469_v1  ;;  %v595_v3 = vpop.f32.mrb[3].mxu1 }
 0x407   :  { %v473_v4 = vmax.f32 %v470_v2, 0.0 }
 0x409   :  { %v474_v5 = vrot.slane %v473_v4, 4  ;;  %v481_v7 = vmul.f32 %v473_v4, %v473_v4 }
 0x40b   :  { %v475_v8 = vadd.f32 %v474_v5, %v473_v4  ;;  %v482_v9 = vrot.slane %v481_v7, 4 }
 0x40d   :  { %v476_v10 = vrot.slane %v475_v8, 2  ;;  %v483_v11 = vadd.f32 %v482_v9, %v481_v7 }
 0x40f   :  { %v477_v12 = vadd.f32 %v476_v10, %v475_v8  ;;  %v484_v13 = vrot.slane %v483_v11, 2 }
 0x411   :  { %v485_v14 = vadd.f32 %v484_v13, %v483_v11  ;;  %v478_v15 = vrot.slane %v477_v12, 1 }
 0x413   :  { %v486_v16 = vrot.slane %v485_v14, 1  ;;  %v479_v17 = vadd.f32 %v478_v15, %v477_v12 }
 0x415   :  { %v487_v18 = vadd.f32 %v486_v16, %v485_v14  ;;  %v480_v19 = vmul.f32 0.125, %v479_v17 }
 0x417   :  { %v488_v20 = vmul.f32 0.125, %v487_v18  ;;  %v489_v21 = vmul.f32 %v480_v19, %v480_v19 }
 0x419   :  { %v490_v22 = vsub.f32 %v488_v20, %v489_v21 }
 0x41b   :  { %v491_v23 = vmax.f32 %v490_v22, 0.0 }
 0x41d   :  { %v494_v24 = vadd.f32 1e-05, %v491_v23 }
 0x41f   :  { %627 = vrsqrt.f32 %v494_v24 }
 0x429   :  { %v628_v26 = vpop.eup %627 }
 0x42a   :  { %v496_v27 = vmul.f32 %v628_v26, %v492_v25 }
 0x42c   :  { %v497_v29 = vmul.f32 %v496_v27, %v480_v19  ;;  %v502_v30 = vrot.slane %v496_v27, %v741_v37 }
 0x42e   :  { %v498_v31 = vsub.f32 %v493_v28, %v497_v29  ;;  %v503_v32 = vmul.f32 %v502_v30, %v473_v4 }
 0x430   :  { %v507_v33 = vrot.slane %v498_v31, %v741_v37 }
 0x432   :  { %v508_v35 = vadd.f32 %v507_v33, %v503_v32 }
 0x434   :  { %v515_v36 = vmul.f32 %v539_v34, %v508_v35 }
 0x436   :  { %516 = vadd.xlane.f32.xlu0 %v515_v36 }
 0x4c3   :  { %v517_v39 = vpop.xlane.xlu0 %516 }
 0x4c4   :  { %v522_v40 = vadd.f32 %v540_v38, %v517_v39 }
 0x4c6   :  { %524 = vst.msk [vmem:[%s763_s2] sm:$0xff] %vm523_vm3, %v522_v40 }
 0x4c7   :  { %529 = vsyncpa [#allocation3], 1 }
 0x4c8   :  { %530 = vsyncpa [#allocation5], 1 }

</bundles_post_ra>
